<compile_context>
chip_gen: v6e
topology: v6e:2x2x1
jax: 0.10.0
libtpu: 0.0.40
codegen_flags: <defaults>
</compile_context>

<pallas_src>
import functools

import jax
import jax.numpy as jnp
import numpy as np
from jax.experimental import pallas as pl
from jax.experimental.pallas import tpu as pltpu

NUM_CLASSES = 527  # AudioSet class count (self.predicts = torch.empty((0, 527)))


def downstream_kernel(x_ref, w1_ref, b1_ref, w2_ref, b2_ref, y_ref,
                      logits_ref, loss_ref, xsum_ref, *, true_t, num_classes):
    """Streaming time-sum of x, then connector -> classifier -> masked BCE epilogue."""
    t = pl.program_id(0)

    @pl.when(t == 0)
    def _init():
        xsum_ref[...] = jnp.zeros_like(xsum_ref)

    # Streaming sum over the time tile (mean-pool commuted ahead of the connector).
    # Zero-padded frames contribute 0; the divisor is the pad_sequence length true_t.
    xsum_ref[...] += jnp.sum(x_ref[...].astype(jnp.float32), axis=1)

    @pl.when(t == pl.num_programs(0) - 1)
    def _finalize():
        pooled_x = xsum_ref[...] * (1.0 / float(true_t))              # (B, Dup) f32

        # connector: Linear(upstream_dim, input_dim)  (applied after the mean — identical)
        h = jnp.dot(pooled_x.astype(w1_ref.dtype), w1_ref[...],
                    preferred_element_type=jnp.float32) + b1_ref[...]  # (B, Din) f32

        # classifier: Linear(input_dim, 527), lane-padded to C_pad columns
        z = jnp.dot(h.astype(w2_ref.dtype), w2_ref[...],
                    preferred_element_type=jnp.float32) + b2_ref[...]  # (B, C_pad) f32

        # single contiguous full-width (lane-dense) store of the logits
        logits_ref[...] = z

        # BCEWithLogitsLoss, reduction='mean', numerically stable form:
        #   max(z, 0) - z*y + log(1 + exp(-|z|)); padded class columns masked out.
        y = y_ref[...]
        per = jnp.maximum(z, 0.0) - z * y + jnp.log1p(jnp.exp(-jnp.abs(z)))
        col = jax.lax.broadcasted_iota(jnp.int32, per.shape, 1)
        per = jnp.where(col < num_classes, per, 0.0)
        b = per.shape[0]
        loss_ref[0, 0] = jnp.sum(per) / (b * num_classes)


def downstream_forward(x, w1, b1, w2, b2, y, *, t_tile=None,
                       stream_dtype=jnp.float32):
    """x: (B, T, upstream_dim) zero-padded features (pad_sequence output).
    y: (B, 527) float multi-hot labels. Returns (logits (B,527), scalar BCE loss)."""
    B, T0, Dup = x.shape
    Din = w1.shape[1]
    C = w2.shape[1]                                   # 527
    C_pad = pl.cdiv(C, 128) * 128                     # 640 -> lane-dense output

    # --- tile-size selection: keep the double-buffered x stream <= ~12 MiB so it
    #     fits the default scoped VMEM limit on v5e/v6e/v7x with headroom. ---
    if t_tile is None:
        bytes_per_row = B * Dup * jnp.dtype(stream_dtype).itemsize
        t_tile = (12 * 1024 * 1024) // (2 * bytes_per_row)
        t_tile = int(min(1024, max(8, t_tile)))
    t_tile = max(8, (min(int(t_tile), ((T0 + 7) // 8) * 8) // 8) * 8)
    T_pad = pl.cdiv(T0, t_tile) * t_tile

    # --- host-side layout plumbing (padding / dtype), no compute hoisted ---
    x_p = jnp.pad(x, ((0, 0), (0, T_pad - T0), (0, 0))).astype(stream_dtype)
    w1_c = w1.astype(stream_dtype)
    w2_p = jnp.pad(w2, ((0, 0), (0, C_pad - C))).astype(stream_dtype)
    b2_p = jnp.pad(b2, ((0, 0), (0, C_pad - C)))
    y_p = jnp.pad(y.astype(jnp.float32), ((0, 0), (0, C_pad - C)))

    kernel = functools.partial(downstream_kernel, true_t=T0, num_classes=C)

    logits_pad, loss = pl.pallas_call(
        kernel,
        out_shape=(
            jax.ShapeDtypeStruct((B, C_pad), jnp.float32),
            jax.ShapeDtypeStruct((1, 1), jnp.float32),
        ),
        grid_spec=pltpu.PrefetchScalarGridSpec(
            num_scalar_prefetch=0,
            grid=(T_pad // t_tile,),                      # stream x over time tiles
            in_specs=[
                pl.BlockSpec((B, t_tile, Dup), lambda t: (0, t, 0)),  # x (pipelined)
                pl.BlockSpec((Dup, Din), lambda t: (0, 0)),           # connector W (resident)
                pl.BlockSpec((1, Din), lambda t: (0, 0)),             # connector b
                pl.BlockSpec((Din, C_pad), lambda t: (0, 0)),         # classifier W (padded)
                pl.BlockSpec((1, C_pad), lambda t: (0, 0)),           # classifier b (padded)
                pl.BlockSpec((B, C_pad), lambda t: (0, 0)),           # labels (padded)
            ],
            out_specs=[
                pl.BlockSpec((B, C_pad), lambda t: (0, 0)),           # lane-dense logits
                pl.BlockSpec(memory_space=pltpu.MemorySpace.SMEM),    # scalar loss
            ],
            scratch_shapes=[pltpu.VMEM((B, Dup), jnp.float32)],       # sum_T(x) accumulator
        ),
        compiler_params=pltpu.CompilerParams(
            dimension_semantics=("arbitrary",)),   # reduction axis (accumulator carried)
        # TODO(synk): a leading "parallel" axis with a 2-way partial-sum combine would
        # engage both v7x TensorCores; single-TC is accepted for this small epilogue.
    )(x_p, w1_c, b1, w2_p, b2_p, y_p)

    return logits_pad[:, :C], loss[0, 0]


def reference_forward(x, w1, b1, w2, b2, y):
    """Original (un-commuted) module math: per-frame connector, mean over T, classifier, BCE."""
    h = jnp.einsum('btd,de->bte', x, w1) + b1
    pooled = jnp.mean(h, axis=1)
    z = pooled @ w2 + b2
    per = jnp.maximum(z, 0.0) - z * y + jnp.log1p(jnp.exp(-jnp.abs(z)))
    return z, jnp.mean(per)


if __name__ == "__main__":
    # Small shapes consistent with the module's forward.
    B = 2                  # batch size
    upstream_dim = 32      # upstream representation dim
    input_dim = 64         # modelrc['input_dim']
    C = NUM_CLASSES        # 527 output classes
    lengths = [37, 25]     # unpadded per-utterance feature lengths
    T = max(lengths)

    key = jax.random.PRNGKey(0)
    k_feat, k_w1, k_b1, k_w2, k_b2, k_lab = jax.random.split(key, 6)

    # features: list of unpadded [T_i, upstream_dim] -> pad_sequence equivalent (zero pad)
    feats_full = jax.random.normal(k_feat, (B, T, upstream_dim), jnp.float32)
    time_mask = (jnp.arange(T)[None, :, None] < jnp.array(lengths)[:, None, None])
    x = feats_full * time_mask.astype(jnp.float32)

    # Deterministic parameter init (PyTorch-Linear-like uniform ranges).
    lim1 = 1.0 / np.sqrt(upstream_dim)
    w1 = jax.random.uniform(k_w1, (upstream_dim, input_dim), jnp.float32, -lim1, lim1)
    b1 = jax.random.uniform(k_b1, (1, input_dim), jnp.float32, -lim1, lim1)
    lim2 = 1.0 / np.sqrt(input_dim)
    w2 = jax.random.uniform(k_w2, (input_dim, C), jnp.float32, -lim2, lim2)
    b2 = jax.random.uniform(k_b2, (1, C), jnp.float32, -lim2, lim2)

    # Multi-hot labels (LongTensor -> float in the reference), built as float32.
    labels = (jax.random.uniform(k_lab, (B, C)) < 0.02).astype(jnp.float32)

    ref_logits, ref_loss = reference_forward(x, w1, b1, w2, b2, labels)

    # f32 streaming path: bit-faithful to the module semantics (t_tile=8 -> 5 grid steps).
    logits, loss = downstream_forward(x, w1, b1, w2, b2, labels, t_tile=8)
    jax.block_until_ready((logits, loss))
    assert np.allclose(np.asarray(logits), np.asarray(ref_logits), atol=1e-4, rtol=1e-4)
    assert np.allclose(float(loss), float(ref_loss), atol=1e-5, rtol=1e-5)

    # bf16 streaming path (halves HBM bytes on the memory-bound x stream; f32 accumulation).
    logits_bf, loss_bf = downstream_forward(x, w1, b1, w2, b2, labels,
                                            t_tile=8, stream_dtype=jnp.bfloat16)
    jax.block_until_ready((logits_bf, loss_bf))
    assert np.allclose(np.asarray(logits_bf), np.asarray(ref_logits), atol=3e-2, rtol=3e-2)
    assert np.allclose(float(loss_bf), float(ref_loss), atol=1e-2, rtol=1e-2)

    # TODO(synk): dataloaders, pad_sequence list-glue, records/logging, mAP computation and
    # the predicts/targets concat buffers are host-side bookkeeping with no Pallas equivalent.
    print("KERNEL_OK")
</pallas_src>

<mosaic_0001>
module attributes {stable_mosaic.version = 11 : i64} {
  func.func @downstream_kernel(%arg0: i32, %arg1: memref<2x8x32xf32, #tpu.memory_space<vmem>>, %arg2: memref<32x64xf32, #tpu.memory_space<vmem>>, %arg3: memref<1x64xf32, #tpu.memory_space<vmem>>, %arg4: memref<64x640xf32, #tpu.memory_space<vmem>>, %arg5: memref<1x640xf32, #tpu.memory_space<vmem>>, %arg6: memref<2x640xf32, #tpu.memory_space<vmem>>, %arg7: memref<2x640xf32, #tpu.memory_space<vmem>>, %arg8: memref<1x1xf32, #tpu.memory_space<smem>>, %arg9: memref<2x32xf32, #tpu.memory_space<vmem>>) attributes {dimension_semantics = [#tpu.dimension_semantics<arbitrary>], iteration_bounds = array<i64: 5>, scalar_prefetch = 0 : i64, scratch_operands = 1 : i64, tpu.core_type = #tpu.core_type<tc>, window_params = [{transform_indices = @transform_0, window_bounds = array<i64: 2, 8, 32>}, {pipeline_mode = #tpu.pipeline_mode<synchronous>, transform_indices = @transform_1, window_bounds = array<i64: 32, 64>}, {pipeline_mode = #tpu.pipeline_mode<synchronous>, transform_indices = @transform_2, window_bounds = array<i64: 1, 64>}, {pipeline_mode = #tpu.pipeline_mode<synchronous>, transform_indices = @transform_3, window_bounds = array<i64: 64, 640>}, {pipeline_mode = #tpu.pipeline_mode<synchronous>, transform_indices = @transform_4, window_bounds = array<i64: 1, 640>}, {pipeline_mode = #tpu.pipeline_mode<synchronous>, transform_indices = @transform_5, window_bounds = array<i64: 2, 640>}, {pipeline_mode = #tpu.pipeline_mode<synchronous>, transform_indices = @transform_6, window_bounds = array<i64: 2, 640>}, {transform_indices = @transform_7, window_bounds = array<i64: 1, 1>}]} {
    %c0_i32 = arith.constant 0 : i32
    %0 = arith.cmpi eq, %arg0, %c0_i32 : i32
    %1 = arith.extui %0 : i1 to i32
    %c0_i32_0 = arith.constant 0 : i32
    %2 = arith.cmpi ne, %1, %c0_i32_0 : i32
    scf.if %2 {
      %cst_8 = arith.constant 0.000000e+00 : f32
      %11 = vector.broadcast %cst_8 : f32 to vector<2x32xf32>
      %c0_9 = arith.constant 0 : index
      %c0_10 = arith.constant 0 : index
      %12 = vector.load %arg9[%c0_9, %c0_10] : memref<2x32xf32, #tpu.memory_space<vmem>>, vector<2x32xf32>
      tpu.vector_store %arg9[%c0_9, %c0_10], %11 {strides = array<i32>} : memref<2x32xf32, #tpu.memory_space<vmem>>, vector<2x32xf32>,
    } else {
    }
    %c0 = arith.constant 0 : index
    %c0_1 = arith.constant 0 : index
    %3 = vector.load %arg9[%c0, %c0_1] : memref<2x32xf32, #tpu.memory_space<vmem>>, vector<2x32xf32>
    %c0_2 = arith.constant 0 : index
    %c0_3 = arith.constant 0 : index
    %c0_4 = arith.constant 0 : index
    %4 = vector.load %arg1[%c0_2, %c0_3, %c0_4] : memref<2x8x32xf32, #tpu.memory_space<vmem>>, vector<2x8x32xf32>
    %cst = arith.constant dense<0.000000e+00> : vector<2x32xf32>
    %5 = vector.multi_reduction <add>, %4, %cst [1] : vector<2x8x32xf32> to vector<2x32xf32>
    %6 = arith.addf %3, %5 : vector<2x32xf32>
    %c0_5 = arith.constant 0 : index
    %c0_6 = arith.constant 0 : index
    %7 = vector.load %arg9[%c0_5, %c0_6] : memref<2x32xf32, #tpu.memory_space<vmem>>, vector<2x32xf32>
    tpu.vector_store %arg9[%c0_5, %c0_6], %6 {strides = array<i32>} : memref<2x32xf32, #tpu.memory_space<vmem>>, vector<2x32xf32>,
    %c4_i32 = arith.constant 4 : i32
    %8 = arith.cmpi eq, %arg0, %c4_i32 : i32
    %9 = arith.extui %8 : i1 to i32
    %c0_i32_7 = arith.constant 0 : i32
    %10 = arith.cmpi ne, %9, %c0_i32_7 : i32
    scf.if %10 {
      %c0_8 = arith.constant 0 : index
      %c0_9 = arith.constant 0 : index
      %11 = vector.load %arg9[%c0_8, %c0_9] : memref<2x32xf32, #tpu.memory_space<vmem>>, vector<2x32xf32>
      %cst_10 = arith.constant 0.0270270277 : f32
      %12 = vector.broadcast %cst_10 : f32 to vector<2x32xf32>
      %13 = arith.mulf %11, %12 : vector<2x32xf32>
      %c0_11 = arith.constant 0 : index
      %c0_12 = arith.constant 0 : index
      %14 = vector.load %arg2[%c0_11, %c0_12] : memref<32x64xf32, #tpu.memory_space<vmem>>, vector<32x64xf32>
      %cst_13 = arith.constant dense<0.000000e+00> : vector<2x64xf32>
      %15 = tpu.matmul %13, %14, %cst_13 {dimension_numbers = #tpu.dot_dimension_numbers<[1], [0], [0], [1], [0, 0, 1, 1], [], []>} : vector<2x32xf32>, vector<32x64xf32>, vector<2x64xf32> -> vector<2x64xf32>
      %c0_14 = arith.constant 0 : index
      %c0_15 = arith.constant 0 : index
      %16 = vector.load %arg3[%c0_14, %c0_15] : memref<1x64xf32, #tpu.memory_space<vmem>>, vector<1x64xf32>
      %17 = vector.broadcast %16 : vector<1x64xf32> to vector<2x64xf32>
      %18 = arith.addf %15, %17 : vector<2x64xf32>
      %c0_16 = arith.constant 0 : index
      %c0_17 = arith.constant 0 : index
      %19 = vector.load %arg4[%c0_16, %c0_17] : memref<64x640xf32, #tpu.memory_space<vmem>>, vector<64x640xf32>
      %cst_18 = arith.constant dense<0.000000e+00> : vector<2x640xf32>
      %20 = tpu.matmul %18, %19, %cst_18 {dimension_numbers = #tpu.dot_dimension_numbers<[1], [0], [0], [1], [0, 0, 1, 1], [], []>} : vector<2x64xf32>, vector<64x640xf32>, vector<2x640xf32> -> vector<2x640xf32>
      %c0_19 = arith.constant 0 : index
      %c0_20 = arith.constant 0 : index
      %21 = vector.load %arg5[%c0_19, %c0_20] : memref<1x640xf32, #tpu.memory_space<vmem>>, vector<1x640xf32>
      %22 = vector.broadcast %21 : vector<1x640xf32> to vector<2x640xf32>
      %23 = arith.addf %20, %22 : vector<2x640xf32>
      %c0_21 = arith.constant 0 : index
      %c0_22 = arith.constant 0 : index
      %24 = vector.load %arg7[%c0_21, %c0_22] : memref<2x640xf32, #tpu.memory_space<vmem>>, vector<2x640xf32>
      tpu.vector_store %arg7[%c0_21, %c0_22], %23 {strides = array<i32>} : memref<2x640xf32, #tpu.memory_space<vmem>>, vector<2x640xf32>,
      %c0_23 = arith.constant 0 : index
      %c0_24 = arith.constant 0 : index
      %25 = vector.load %arg6[%c0_23, %c0_24] : memref<2x640xf32, #tpu.memory_space<vmem>>, vector<2x640xf32>
      %cst_25 = arith.constant 0.000000e+00 : f32
      %26 = vector.broadcast %cst_25 : f32 to vector<2x640xf32>
      %27 = arith.maximumf %23, %26 : vector<2x640xf32>
      %28 = arith.mulf %23, %25 : vector<2x640xf32>
      %29 = arith.subf %27, %28 : vector<2x640xf32>
      %30 = math.absf %23 : vector<2x640xf32>
      %cst_26 = arith.constant 0.000000e+00 : f32
      %31 = vector.broadcast %cst_26 : f32 to vector<2x640xf32>
      %32 = arith.subf %31, %30 : vector<2x640xf32>
      %33 = math.exp %32 : vector<2x640xf32>
      %34 = math.log1p %33 : vector<2x640xf32>
      %35 = arith.addf %29, %34 : vector<2x640xf32>
      %36 = tpu.iota {dimensions = array<i32: 1>} : vector<2x640xi32>
      %c527_i32 = arith.constant 527 : i32
      %37 = vector.broadcast %c527_i32 : i32 to vector<2x640xi32>
      %38 = arith.cmpi slt, %36, %37 : vector<2x640xi32>
      %cst_27 = arith.constant 0.000000e+00 : f32
      %39 = vector.broadcast %cst_27 : f32 to vector<2x640xf32>
      %40 = arith.select %38, %35, %39 : vector<2x640xi1>, vector<2x640xf32>
      %41 = vector.shape_cast %40 : vector<2x640xf32> to vector<1x2x640xf32>
      %cst_28 = arith.constant dense<0.000000e+00> : vector<1xf32>
      %42 = vector.multi_reduction <add>, %41, %cst_28 [1, 2] : vector<1x2x640xf32> to vector<1xf32>
      %43 = vector.shape_cast %42 : vector<1xf32> to vector<1x1x1xf32>
      %44 = vector.extract %43[0, 0, 0] : f32 from vector<1x1x1xf32>
      %cst_29 = arith.constant 1.054000e+03 : f32
      %45 = arith.divf %44, %cst_29 : f32
      %c0_30 = arith.constant 0 : index
      %c0_31 = arith.constant 0 : index
      %46 = memref.load %arg8[%c0_30, %c0_31] : memref<1x1xf32, #tpu.memory_space<smem>>
      memref.store %45, %arg8[%c0_30, %c0_31] : memref<1x1xf32, #tpu.memory_space<smem>>
    } else {
    }
    return
  }
  func.func @transform_0(%arg0: i32) -> (i32, i32, i32) {
    %c0_i32 = arith.constant 0 : i32
    %c0_i32_0 = arith.constant 0 : i32
    %c0_i32_1 = arith.constant 0 : i32
    return %c0_i32, %arg0, %c0_i32_0 : i32, i32, i32
  }
  func.func @transform_1(%arg0: i32) -> (i32, i32) {
    %c0_i32 = arith.constant 0 : i32
    %c0_i32_0 = arith.constant 0 : i32
    %c0_i32_1 = arith.constant 0 : i32
    return %c0_i32, %c0_i32_0 : i32, i32
  }
  func.func @transform_2(%arg0: i32) -> (i32, i32) {
    %c0_i32 = arith.constant 0 : i32
    %c0_i32_0 = arith.constant 0 : i32
    %c0_i32_1 = arith.constant 0 : i32
    return %c0_i32, %c0_i32_0 : i32, i32
  }
  func.func @transform_3(%arg0: i32) -> (i32, i32) {
    %c0_i32 = arith.constant 0 : i32
    %c0_i32_0 = arith.constant 0 : i32
    %c0_i32_1 = arith.constant 0 : i32
    return %c0_i32, %c0_i32_0 : i32, i32
  }
  func.func @transform_4(%arg0: i32) -> (i32, i32) {
    %c0_i32 = arith.constant 0 : i32
    %c0_i32_0 = arith.constant 0 : i32
    %c0_i32_1 = arith.constant 0 : i32
    return %c0_i32, %c0_i32_0 : i32, i32
  }
  func.func @transform_5(%arg0: i32) -> (i32, i32) {
    %c0_i32 = arith.constant 0 : i32
    %c0_i32_0 = arith.constant 0 : i32
    %c0_i32_1 = arith.constant 0 : i32
    return %c0_i32, %c0_i32_0 : i32, i32
  }
  func.func @transform_6(%arg0: i32) -> (i32, i32) {
    %c0_i32 = arith.constant 0 : i32
    %c0_i32_0 = arith.constant 0 : i32
    %c0_i32_1 = arith.constant 0 : i32
    return %c0_i32, %c0_i32_0 : i32, i32
  }
  func.func @transform_7(%arg0: i32) -> (i32, i32) {
    %c0_i32 = arith.constant 0 : i32
    %c0_i32_0 = arith.constant 0 : i32
    %c0_i32_1 = arith.constant 0 : i32
    return %c0_i32, %c0_i32_0 : i32, i32
  }
}

</mosaic_0001>

<bundles_post_ra>
// kernel: tpu_custom_call.1
= control target key start
LH: loop header
LB: loop body
LE: loop exit
PB: predicated region body
PF: predicated region fallthrough
CT: control target
= control target key end

     0   :  { %13 = vsyncpa [#allocation5], 0  ;;  %s1499_s0 = inlined_call_operand.vmem [shape: f32[2,40,32], index: 0, kind: input, shape index: {}]   ;;  %s1500_s1 = inlined_call_operand.vmem [shape: f32[32,64], index: 1, kind: input, shape index: {}]   ;;  %s1501_s2 = inlined_call_operand.vmem [shape: f32[1,64], index: 2, kind: input, shape index: {}]   ;;  %s1502_s3 = inlined_call_operand.hbm [shape: f32[64,640], index: 3, kind: input, shape index: {}]   ;;  %s1503_s4 = inlined_call_operand.vmem [shape: f32[1,640], index: 4, kind: input, shape index: {}]   ;;  %s1504_s5 = inlined_call_operand.vmem [shape: f32[2,640], index: 5, kind: input, shape index: {}]   ;;  %s1505_s6 = inlined_call_operand.hbm [shape: f32[2,640], index: 6, kind: output, shape index: {0}]   ;;  %s1506_s7 = inlined_call_operand.hbm [shape: f32[1,1], index: 7, kind: output, shape index: {1}]  }
   0x1   :  { %14 = vsyncpa [#allocation6], 0 }
   0x2   :  { %15 = vsyncpa [#allocation7], 0  ;;  %s1292_s24 = smov 0   ;;  %s1294_s25 = smov 0  }
   0x3   :  { %s1296_s26 = smov 0  }
   0x4 LB: > { %s1308_s27 = sadd.s32 4294967295, %s1241_s26   ;;  %s1311_s28 = sadd.s32 1, %s1241_s26   ;;  %s1241_s26 = sphi %s1296_s26, %s1516_s26   ;;  %s1237_s25 = sphi %s1294_s25, %s1515_s25   ;;  %s1233_s24 = sphi %s1292_s24, %s1514_s24  }
   0x5   : > { %s25_s29 = ssub.s32 %s1241_s26, %s1311_s28  ;;  %s28_s30 = sadd.s32 1, %s1237_s25 }
   0x6   : > { %p26_p0 = scmp.eq.s32.totalorder %s25_s29, 0  ;;  %p35_p1 = scmp.ne.s32.totalorder %s1237_s25, %s1233_s24 }
   0x7   : > { %p36_p2 = scmp.eq.s32.totalorder %s1241_s26, 0  ;;  %p1002_p3 = scmp.ge.s32.totalorder %s1241_s26, 1 }
   0x8   : > { %s1321_s8 = scalar_select %p26_p0, %s1237_s25, %s28_s30  }
   0x9   : > { %p1323_p4 = por %p36_p2, %p35_p1  ;;  %p199_p5 = scmp.lt.s32.totalorder %s1241_s26, 6 }
   0xa   : > { %p1087_p7 = scmp.eq.s32.totalorder %s1308_s27, 0  ;;  %s1243_s11 = smov [#allocation4]  }
   0xb   : > { %p1330_p8 = pnand %p1002_p3, %p199_p5  ;;  %s217_s12 = sshll.u32 %s1243_s11, 4  ;;  %s218_s12 = int_to_ptr.vmem [resolvable:$true] %s217_s12 }
   0xc   : > { %s1158_s13 = scalar_lea.vmem %s218_s12, 5120  ;;  %p1166_p1 = scmp.lt.s32.totalorder %s218_s12, %s218_s12 }
   0xd   : > { %p1083_p9 = pneg %p1330_p8  ;;  %p1159_p12 = scmp.ne.s32.totalorder %s218_s12, %s1158_s13 }
   0xe   : > { %p1167_p2 = scmp.lt.s32.totalorder %s1158_s13, %s1158_s13 }
   0xf   : > { %p1084_p10 = pnand %p1087_p7, %p1083_p9 }
  0x10   : > { %p1168_p6 = por %p1167_p2, %p1166_p1 }
  0x11   : > { %p1149_p11 = pneg %p1084_p10 }
  0x13   : > { %p1161_p13 = pnand %p1159_p12, %p1149_p11 }
  0x15   : > { %p1162_p0 = pneg %p1161_p13 }
  0x17   : > { %p1169_p3 = pnand %p1168_p6, %p1162_p0 }
  0x19   : > { %1172 = shalt.err (!%p1169_p3)
}
  0x1a   : > { %s1244_s14 = smov 640   ;;  %s1245_s15 = smov 40  }
  0x1b   : > { %1086 = dma.hbm_to_vmem [thread:$0]  (!%p1084_p10), %s1502_s3, 5120, %s218_s12, [#allocation5], %s1244_s14, %s1244_s14, %s1245_s15  }
  0x1c   : > { %p1004_p5 = scmp.ge.s32.totalorder %s1241_s26, 5 }
  0x1e   : > { %233 = sbr.rel (%p1004_p5) target bundleno = 40 (0x28), region = 36 }
  0x23   : > { %236 = sbr.rel (!%p1323_p4) target bundleno = 40 (0x28), region = 40  ;;  %s238_s18 = sand.u32 (%p1323_p4), 1, %s1237_s25  }
  0x24   : > { %s1006_s19 = sshll.u32 (%p1323_p4), %s1241_s26, 3  ;;  %s1005_s20 = sshll.u32 (%p1323_p4), %s238_s18, 4 }
  0x25   : > { %s242_s23 = scalar_lea.vmem (%p1323_p4), %s1499_s0, %s1006_s19  ;;  %s240_s29 = scalar_lea.vmem (%p1323_p4), [#allocation3], %s1005_s20 }
  0x26   : > { %v273_v0 = vld [vmem:[%s242_s23] sm:$0xff] (%p1323_p4)  ;;  %v275_v1 = vld [vmem:[%s242_s23 + $0x28] sm:$0xff] (%p1323_p4) }
  0x27   : > { %274 = vst [vmem:[%s240_s29] sm:$0xff] (%p1323_p4), %v273_v0  ;;  %276 = vst [vmem:[%s240_s29 + $0x8] sm:$0xff] (%p1323_p4), %v275_v1 }
  0x28 PF: > { %285 = sbr.rel (%p1330_p8) target bundleno = 756 (0x2f4), region = 78  ;;  %s288_s30 = sand.u32 (!%p1330_p8), 1, %s1233_s24  }
  0x29   : > { %s1008_s9 = sshll.u32 (!%p1330_p8), %s288_s30, 4 }
  0x2a   : > { %s290_s26 = scalar_lea.vmem (!%p1330_p8), [#allocation3], %s1008_s9 }
  0x2d   : > { %1220 = dma.done.wait (%p1087_p7), [#allocation5], 5120  }
  0x2e   : > { %1222 = vsyncadd (%p1087_p7), [#allocation5], 4294962176  ;;  %p1509_p4 = scmp.ne.s32.totalorder %s1308_s27, 0 }
  0x30   : > { %321 = sbr.rel (%p1509_p4) target bundleno = 55 (0x37), region = 90 }
  0x35   : > { %vm322_vm0 = vcmask 254976   ;;  %v1246_v2 = vmov 0.0  }
  0x36   : > { %323 = vst.msk [vmem:[#allocation2] sm:$0x3] %vm322_vm0, %v1246_v2 }
  0x37 PF: > { %v325_v3 = vld [vmem:[%s290_s26] sm:$0xff]  ;;  %v326_v4 = vld [vmem:[%s290_s26 + $0x8] sm:$0xff]  ;;  %vm327_vm1 = vcmask 261120   ;;  %vm344_vm2 = vcmask 1041409   ;;  %vm348_vm3 = vcmask 254976   ;;  %p1011_p6 = scmp.ne.s32.totalorder %s1308_s27, 4 }
  0x38   : > { %v328_v5 = vsel %vm327_vm1, %v325_v3, 0.0  ;;  %v335_v6 = vsel %vm327_vm1, %v326_v4, 0.0 }
  0x39   : > { %v329_v7 = vrot.slane %v328_v5, 4  ;;  %v336_v8 = vrot.slane %v335_v6, 4 }
  0x3b   : > { %v330_v9 = vadd.f32 %v329_v7, %v328_v5  ;;  %v337_v10 = vadd.f32 %v336_v8, %v335_v6 }
  0x3d   : > { %v331_v11 = vrot.slane %v330_v9, 2  ;;  %v338_v12 = vrot.slane %v337_v10, 2  ;;  %v324_v17 = vld [vmem:[#allocation2] sm:$0x3] }
  0x3f   : > { %v332_v13 = vadd.f32 %v331_v11, %v330_v9  ;;  %v339_v14 = vadd.f32 %v338_v12, %v337_v10 }
  0x41   : > { %v333_v15 = vrot.slane %v332_v13, 1  ;;  %v340_v16 = vrot.slane %v339_v14, 1 }
  0x43   : > { %v334_v18 = vadd.f32 %v333_v15, %v332_v13  ;;  %v341_v19 = vadd.f32 %v340_v16, %v339_v14 }
  0x44   : > { %353 = sbr.rel (%p1011_p6) target bundleno = 736 (0x2e0), region = 94 }
  0x45   : > { %v345_v20 = vsel %vm344_vm2, %v341_v19, %v334_v18 }
  0x46   : > { %v347_v21 = vadd.f32 %v345_v20, %v324_v17 }
  0x48   : > { %349 = vst.msk [vmem:[#allocation2] sm:$0x3] %vm348_vm3, %v347_v21 }
  0x49   : > { %v359_v22 = vld [vmem:[%s1500_s1 + $0x18] sm:$0xff]  ;;  %v1247_v23 = vmov 0.0   ;;  %v358_v24 = vld [vmem:[%s1500_s1 + $0x10] sm:$0xff]  ;;  %vm1248_vm4 = vmmov 0   ;;  %v476_v25 = vld [vmem:[#allocation4 + $0x120] sm:$0xff]  ;;  %vm507_vm5 = vcmask 523264   ;;  %v482_v9 = vlaneseq }
  0x4a   : > { %1039 = vmatprep.subr.mxu0 %v1247_v23  ;;  %1047 = vmatprep.mubr.msk.f32.mxu0 %vm1248_vm4, %v1247_v23  ;;  %v475_v27 = vld [vmem:[#allocation4 + $0x118] sm:$0xff]  ;;  %v357_v29 = vld [vmem:[%s1500_s1 + $0x8] sm:$0xff]  ;;  %v470_v30 = vld [vmem:[#allocation4 + $0xf0] sm:$0xff]  ;;  %v1249_v18 = vmov 1983009808   ;;  %vm890_vm9 = vcmask 1041408  }
  0x4b   : > { %1040 = vmatpush3.msra.mxu0 %v359_v22  ;;  %527 = vmatprep.subr.mxu1 %v476_v25  ;;  %v471_v28 = vld [vmem:[#allocation4 + $0xf8] sm:$0xff]  ;;  %v466_v31 = vld [vmem:[#allocation4 + $0xd0] sm:$0xff]  ;;  %v465_v32 = vld [vmem:[#allocation4 + $0xc8] sm:$0xff]  ;;  %v483_v10 = vshrl.u32 %v482_v9, 7  ;;  %v731_v19 = vunpack.c.l.s4 %v1249_v18 }
  0x4c   : > { %1041 = vmatprep.subr.mxu0 %v1247_v23  ;;  %528 = vmatpush1.msra.mxu1 %v475_v27  ;;  %v356_v33 = vld [vmem:[%s1500_s1] sm:$0xff]  ;;  %v461_v35 = vld [vmem:[#allocation4 + $0xa8] sm:$0xff]  ;;  %v478_v36 = vld [vmem:[#allocation4 + $0x130] sm:$0xff] }
  0x4d   : > { %1042 = vmatpush3.msra.mxu0 %v358_v24  ;;  %529 = vmatprep.subr.mxu1 %v471_v28  ;;  %v477_v37 = vld [vmem:[#allocation4 + $0x128] sm:$0xff]  ;;  %v460_v38 = vld [vmem:[#allocation4 + $0xa0] sm:$0xff]  ;;  %v455_v42 = vld [vmem:[#allocation4 + $0x78] sm:$0xff]  ;;  %v484_v11 = vsub.s32 0, %v483_v10  ;;  %v492_v12 = vsub.s32 2, %v483_v10  ;;  %v488_v14 = vsub.s32 1, %v483_v10 }
  0x4e   : > { %1043 = vmatprep.subr.mxu0 %v1247_v23  ;;  %530 = vmatpush1.msra.mxu1 %v470_v30  ;;  %v473_v39 = vld [vmem:[#allocation4 + $0x108] sm:$0xff]  ;;  %v456_v40 = vld [vmem:[#allocation4 + $0x80] sm:$0xff]  ;;  %v451_v44 = vld [vmem:[#allocation4 + $0x58] sm:$0xff]  ;;  %v496_v15 = vsub.s32 3, %v483_v10 }
  0x4f   : > { %v354_v26 = vld [vmem:[#allocation2] sm:$0x3]  ;;  %1044 = vmatpush3.msra.mxu0 %v357_v29  ;;  %531 = vmatprep.subr.mxu1 %v466_v31  ;;  %v472_v41 = vld [vmem:[#allocation4 + $0x100] sm:$0xff]  ;;  %v450_v46 = vld [vmem:[#allocation4 + $0x50] sm:$0xff] }
  0x50   : > { %v355_v34 = vmul.f32 0.027027028, %v354_v26  ;;  %1045 = vmatprep.subr.mxu0 %v1247_v23  ;;  %532 = vmatpush1.msra.mxu1 %v465_v32  ;;  %v468_v43 = vld [vmem:[#allocation4 + $0xe0] sm:$0xff]  ;;  %v467_v45 = vld [vmem:[#allocation4 + $0xd8] sm:$0xff]  ;;  %v446_v48 = vld [vmem:[#allocation4 + $0x30] sm:$0xff]  ;;  %v732_v26 = vunpack.c.0.s8 %v731_v19 }
  0x51   : > { %1046 = vmatpush3.msra.mxu0 %v356_v33  ;;  %533 = vmatprep.subr.mxu1 %v461_v35  ;;  %v463_v47 = vld [vmem:[#allocation4 + $0xb8] sm:$0xff]  ;;  %v462_v49 = vld [vmem:[#allocation4 + $0xb0] sm:$0xff]  ;;  %v445_v50 = vld [vmem:[#allocation4 + $0x28] sm:$0xff] }
  0x52   : > { %1048 = vmatmul.mubr.msk.f32.vlgmr.msra.gmra.mxu0 %vm327_vm1, %v355_v34  ;;  %598 = vmatprep.subr.mxu0 %v478_v36  ;;  %v458_v51 = vld [vmem:[#allocation4 + $0x90] sm:$0xff]  ;;  %v457_v52 = vld [vmem:[#allocation4 + $0x88] sm:$0xff]  ;;  %v452_v54 = vld [vmem:[#allocation4 + $0x60] sm:$0xff]  ;;  %v735_v34 = vsub.s32 %v732_v26, %v483_v10 }
  0x53   : > { %599 = vmatpush1.msra.mxu0 %v477_v37  ;;  %534 = vmatpush1.msra.mxu1 %v460_v38  ;;  %v453_v53 = vld [vmem:[#allocation4 + $0x68] sm:$0xff]  ;;  %v448_v55 = vld [vmem:[#allocation4 + $0x40] sm:$0xff]  ;;  %v447_v57 = vld [vmem:[#allocation4 + $0x38] sm:$0xff] }
  0x54   : > { %600 = vmatprep.subr.mxu0 %v473_v39  ;;  %535 = vmatprep.subr.mxu1 %v456_v40  ;;  %v441_v56 = vld [vmem:[#allocation4 + $0x8] sm:$0xff]  ;;  %v440_v58 = vld [vmem:[#allocation4] sm:$0xff]  ;;  %v443_v59 = vld [vmem:[#allocation4 + $0x18] sm:$0xff] }
  0x55   : > { %601 = vmatpush1.msra.mxu0 %v472_v41  ;;  %536 = vmatpush1.msra.mxu1 %v455_v42  ;;  %v442_v60 = vld [vmem:[#allocation4 + $0x10] sm:$0xff]  ;;  %v1012_v61 = vld [vmem:[%s1501_s2] ss:$0 sm:$0xff]  ;;  %v469_v3 = vld [vmem:[#allocation4 + $0xe8] sm:$0xff]  ;;  %v500_v42 = vsub.s32 4, %v483_v10 }
  0x56   : > { %602 = vmatprep.subr.mxu0 %v468_v43  ;;  %537 = vmatprep.subr.mxu1 %v451_v44  ;;  %v479_v0 = vld [vmem:[#allocation4 + $0x138] sm:$0xff]  ;;  %v474_v2 = vld [vmem:[#allocation4 + $0x110] sm:$0xff]  ;;  %v464_v4 = vld [vmem:[#allocation4 + $0xc0] sm:$0xff] }
  0x57   : > { %603 = vmatpush1.msra.mxu0 %v467_v45  ;;  %538 = vmatpush1.msra.mxu1 %v450_v46  ;;  %v459_v5 = vld [vmem:[#allocation4 + $0x98] sm:$0xff]  ;;  %v454_v6 = vld [vmem:[#allocation4 + $0x70] sm:$0xff]  ;;  %v449_v7 = vld [vmem:[#allocation4 + $0x48] sm:$0xff] }
  0x58   : > { %604 = vmatprep.subr.mxu0 %v463_v47  ;;  %539 = vmatprep.subr.mxu1 %v446_v48  ;;  %v444_v8 = vld [vmem:[#allocation4 + $0x20] sm:$0xff] }
  0x59   : > { %605 = vmatpush1.msra.mxu0 %v462_v49  ;;  %540 = vmatpush1.msra.mxu1 %v445_v50  ;;  %v480_v13 = vld [vmem:[%s1503_s4] sm:$0x1f] }
  0x5a   : > { %606 = vmatprep.subr.mxu0 %v458_v51  ;;  %575 = vmatprep.mubr.f32.mxu1 %v1247_v23  ;;  %v485_v16 = vrot.slane %v480_v13, %v484_v11  ;;  %v493_v17 = vrot.slane %v480_v13, %v492_v12  ;;  %v489_v22 = vrot.slane %v480_v13, %v488_v14 }
  0x5b   : > { %607 = vmatpush1.msra.mxu0 %v457_v52  ;;  %646 = vmatprep.mubr.f32.mxu0 %v1247_v23  ;;  %v501_v50 = vrot.slane %v480_v13, %v500_v42 }
  0x5c   : > { %608 = vmatprep.subr.mxu0 %v453_v53  ;;  %541 = vmatprep.subr.mxu1 %v441_v56 }
  0x5d   : > { %609 = vmatpush1.msra.mxu0 %v452_v54  ;;  %542 = vmatpush1.msra.mxu1 %v440_v58 }
  0x5e   : > { %610 = vmatprep.subr.mxu0 %v448_v55  ;;  %1050 = vmatprep.subr.mxu1 %v1247_v23 }
  0x5f   : > { %611 = vmatpush1.msra.mxu0 %v447_v57 }
  0x60   : > { %612 = vmatprep.subr.mxu0 %v443_v59 }
  0x61   : > { %613 = vmatpush1.msra.mxu0 %v442_v60 }
 0x112   : > { %v436_v62 = vpop.f32.mrf.mxu0 }
 0x113   : > { %v437_v63 = vadd.f32 %v1012_v61, %v436_v62 }
 0x114   : > { %v1049_v1 = vpop.f32.mrf.mxu0 }
 0x115   : > { %1014 = vmatmul.mubr.msk.f32.vlgmr.msra.gmra.mxu1 %vm507_vm5, %v437_v63  ;;  %1015 = vmatmul.mubr.msk.f32.vlgmr.msra.gmra.mxu0 %vm507_vm5, %v437_v63  ;;  %v756_v1 = vld [vmem:[%s1504_s5] sm:$0xff] }
 0x116   : > { %1051 = vmatpush3.msra.mxu1 %v479_v0  ;;  %1066 = vmatprep.mubr.msk.f32.mxu1 %vm1248_vm4, %v1247_v23 }
 0x117   : > { %1052 = vmatprep.subr.mxu1 %v1247_v23 }
 0x118   : > { %1053 = vmatpush3.msra.mxu1 %v474_v2  ;;  %v772_v2 = vrot.slane %v756_v1, %v735_v34 }
 0x119   : > { %1054 = vmatprep.subr.mxu1 %v1247_v23 }
 0x11a   : > { %1055 = vmatpush3.msra.mxu1 %v469_v3  ;;  %v765_v3 = vcombine.high %v756_v1, %v756_v1 }
 0x11b   : > { %1056 = vmatprep.subr.mxu1 %v1247_v23 }
 0x11c   : > { %1057 = vmatpush3.msra.mxu1 %v464_v4 }
 0x11d   : > { %1058 = vmatprep.subr.mxu1 %v1247_v23 }
 0x11e   : > { %1059 = vmatpush3.msra.mxu1 %v459_v5 }
 0x11f   : > { %1060 = vmatprep.subr.mxu1 %v1247_v23 }
 0x120   : > { %1061 = vmatpush3.msra.mxu1 %v454_v6  ;;  %v780_v6 = vcombine.high %v772_v2, %v772_v2 }
 0x121   : > { %1062 = vmatprep.subr.mxu1 %v1247_v23 }
 0x122   : > { %1063 = vmatpush3.msra.mxu1 %v449_v7 }
 0x123   : > { %1064 = vmatprep.subr.mxu1 %v1247_v23  ;;  %v497_v23 = vrot.slane %v480_v13, %v496_v15 }
 0x124   : > { %1065 = vmatpush3.msra.mxu1 %v444_v8  ;;  %v779_v8 = vrot.slane %v765_v3, %v735_v34 }
 0x125   : > { %1067 = vmatmul.mubr.msk.f32.vlgmr.msra.gmra.mxu1 %vm507_vm5, %v437_v63 }
 0x126   : > { %v781_v26 = vcombine.high %v779_v8, %v779_v8 }
 0x1d5   : > { %v577_v20 = vpop.f32.mrf.mxu1  ;;  %v648_v21 = vpop.f32.mrf.mxu0 }
 0x1d6   : > { %v1402_v24 = vadd.f32 %v577_v20, %v485_v16  ;;  %v1404_v25 = vadd.f32 %v648_v21, %v493_v17 }
 0x1d7   : > { %v579_v27 = vpop.f32.mrf.mxu1  ;;  %v650_v28 = vpop.f32.mrf.mxu0 }
 0x1d8   : > { %v804_v29 = vand.u32 2147483647, %v1402_v24  ;;  %v806_v30 = vand.u32 2147483647, %v1404_v25  ;;  %v1408_v31 = vadd.f32 %v579_v27, %v489_v22  ;;  %v1410_v32 = vadd.f32 %v650_v28, %v497_v23 }
 0x1d9   : > { %v758_v21 = vmax.f32 %v1402_v24, 0.0  ;;  %v794_v22 = vmul.f32 %v772_v2, %v1402_v24 }
 0x1da   : > { %v809_v33 = vsub.f32 0.0, %v804_v29  ;;  %v811_v35 = vsub.f32 0.0, %v806_v30  ;;  %v728_v36 = vcombine.low %v1402_v24, %v1408_v31  ;;  %v805_v38 = vand.u32 2147483647, %v1408_v31 }
 0x1db   : > { %v729_v39 = vcombine.low %v1404_v25, %v1410_v32  ;;  %v807_v45 = vand.u32 2147483647, %v1410_v32  ;;  %v759_v16 = vmax.f32 %v1408_v31, 0.0  ;;  %v795_v17 = vmul.f32 %v780_v6, %v1408_v31 }
 0x1dc   : > { %v814_v37 = vmul.f32 1.442695, %v809_v33  ;;  %v818_v40 = vmul.f32 1.442695, %v811_v35  ;;  %v736_v41 = vrot.slane %v728_v36, %v735_v34  ;;  %v810_v43 = vsub.f32 0.0, %v805_v38 }
 0x1dd   : > { %v743_v44 = vrot.slane %v729_v39, %v735_v34  ;;  %v812_v48 = vsub.f32 0.0, %v807_v45  ;;  %v800_v35 = vsub.f32 %v759_v16, %v795_v17  ;;  %v799_v38 = vsub.f32 %v758_v21, %v794_v22 }
 0x1de   : > { %1127 = vpow2.f32 %v814_v37  ;;  %v816_v46 = vmul.f32 1.442695, %v810_v43  ;;  %v760_v39 = vmax.f32 %v1404_v25, 0.0 }
 0x1df   : > { %1129 = vpow2.f32 %v818_v40  ;;  %v744_v47 = vcombine.low %v736_v41, %v743_v44  ;;  %v820_v49 = vmul.f32 1.442695, %v812_v48  ;;  %v796_v40 = vmul.f32 %v779_v8, %v1404_v25 }
 0x1e0   : > { %1131 = vpow2.f32 %v816_v46  ;;  %v761_v25 = vmax.f32 %v1410_v32, 0.0 }
 0x1e1   : > { %754 = vst [vmem:[#allocation8] sm:$0xff] %v744_v47  ;;  %1133 = vpow2.f32 %v820_v49 }
 0x1e5   : > { %v719_v51 = vpop.f32.mrf.mxu1 }
 0x1e6   : > { %v1418_v52 = vadd.f32 %v719_v51, %v501_v50  ;;  %v875_v51 = vand.u32 127, %v482_v9 }
 0x1e7   : > { %v1068_v53 = vpop.f32.mrf.mxu1 }
 0x1e8   : > { %1017 = vst.sshfl [vmem:[#allocation8 + $0x8] sm:$0x3 pattern:$0x76325410] %v1418_v52  ;;  %v808_v54 = vand.u32 2147483647, %v1418_v52  ;;  %v797_v53 = vmul.f32 %v781_v26, %v1410_v32 }
 0x1e9   : > { %v879_v2 = vadd.s32 512, %v875_v51 }
 0x1ea   : > { %v813_v55 = vsub.f32 0.0, %v808_v54  ;;  %v1018_v54 = vld.sshfl [vmem:[%s1504_s5 + $0x8] sm:$0x3 pattern:$0x76325410]  ;;  %v802_v1 = vsub.f32 %v761_v25, %v797_v53 }
 0x1eb   : > { %v1128_v56 = vpop.eup %1127  ;;  %vm884_vm12 = vcmp.lt.s32.totalorder %v879_v2, 527 }
 0x1ec   : > { %v1130_v57 = vpop.eup %1129  ;;  %v822_v58 = vmul.f32 1.442695, %v813_v55  ;;  %v824_v59 = vadd.f32 1.0, %v1128_v56  ;;  %v827_v4 = vmul.f32 -0.5, %v1128_v56  ;;  %v830_v13 = vand.u32 2147483647, %v1128_v56 }
 0x1ed   : > { %v842_v60 = vadd.f32 1.0, %v1130_v57  ;;  %v1132_v61 = vpop.eup %1131  ;;  %v845_v11 = vmul.f32 -0.5, %v1130_v57  ;;  %v848_v34 = vand.u32 2147483647, %v1130_v57  ;;  %v801_v55 = vsub.f32 %v760_v39, %v796_v40 }
 0x1ee   : > { %1135 = vpow2.f32 %v822_v58  ;;  %v833_v62 = vadd.f32 1.0, %v1132_v61  ;;  %v1422_v63 = vpop.eup %1133  ;;  %v836_v5 = vmul.f32 -0.5, %v1132_v61  ;;  %v828_v10 = vadd.f32 1.0, %v827_v4 }
 0x1ef   : > { %1137 = vlog2.f32 %v824_v59  ;;  %v851_v0 = vadd.f32 1.0, %v1422_v63  ;;  %v839_v19 = vand.u32 2147483647, %v1132_v61  ;;  %v846_v28 = vadd.f32 1.0, %v845_v11 }
 0x1f0   : > { %1139 = vlog2.f32 %v842_v60  ;;  %v837_v14 = vadd.f32 1.0, %v836_v5  ;;  %v829_v27 = vmul.f32 %v1128_v56, %v828_v10  ;;  %v854_v29 = vmul.f32 -0.5, %v1422_v63 }
 0x1f1   : > { %1141 = vlog2.f32 %v833_v62  ;;  %vm1436_vm6 = vcmp.lt.f32.partialorder %v830_v13, 0.0004427343  ;;  %vm840_vm7 = vcmp.lt.f32.partialorder %v839_v19, 0.0004427343  ;;  %v847_v42 = vmul.f32 %v1130_v57, %v846_v28 }
 0x1f2   : > { %1143 = vlog2.f32 %v851_v0  ;;  %v838_v31 = vmul.f32 %v1132_v61, %v837_v14  ;;  %v855_v43 = vadd.f32 1.0, %v854_v29  ;;  %vm1444_vm8 = vcmp.lt.f32.partialorder %v848_v34, 0.0004427343 }
 0x1f3   : > { %v857_v46 = vand.u32 2147483647, %v1422_v63  ;;  %v762_v57 = vmax.f32 %v1418_v52, 0.0  ;;  %v798_v61 = vmul.f32 %v1018_v54, %v1418_v52 }
 0x1f4   : > { %v856_v58 = vmul.f32 %v1422_v63, %v855_v43 }
 0x1f5   : > { %vm858_vm10 = vcmp.lt.f32.partialorder %v857_v46, 0.0004427343  ;;  %v803_v8 = vsub.f32 %v762_v57, %v798_v61 }
 0x1fb   : > { %v1428_v7 = vpop.eup %1135 }
 0x1fc   : > { %v1138_v12 = vpop.eup %1137  ;;  %v860_v15 = vadd.f32 1.0, %v1428_v7  ;;  %v863_v47 = vmul.f32 -0.5, %v1428_v7  ;;  %v866_v32 = vand.u32 2147483647, %v1428_v7 }
 0x1fd   : > { %v826_v18 = vmul.f32 0.6931472, %v1138_v12  ;;  %v1140_v20 = vpop.eup %1139 }
 0x1fe   : > { %1145 = vlog2.f32 %v860_v15  ;;  %v1142_v23 = vpop.eup %1141  ;;  %v844_v24 = vmul.f32 0.6931472, %v1140_v20  ;;  %v864_v59 = vadd.f32 1.0, %v863_v47  ;;  %vm867_vm11 = vcmp.lt.f32.partialorder %v866_v32, 0.0004427343 }
 0x1ff   : > { %v835_v33 = vmul.f32 0.6931472, %v1142_v23  ;;  %v832_v36 = vsel %vm1436_vm6, %v829_v27, %v826_v18  ;;  %v1144_v37 = vpop.eup %1143 }
 0x200   : > { %v869_v48 = vadd.f32 %v832_v36, %v799_v38  ;;  %v850_v49 = vsel %vm1444_vm8, %v847_v42, %v844_v24  ;;  %v853_v50 = vmul.f32 0.6931472, %v1144_v37  ;;  %v865_v5 = vmul.f32 %v1428_v7, %v864_v59 }
 0x201   : > { %v841_v41 = vsel %vm840_vm7, %v838_v31, %v835_v33  ;;  %v871_v60 = vadd.f32 %v850_v49, %v801_v55 }
 0x202   : > { %v870_v44 = vadd.f32 %v841_v41, %v800_v35  ;;  %v891_v9 = vsel %vm890_vm9, %v869_v48, 0.0  ;;  %v859_v62 = vsel %vm858_vm10, %v856_v58, %v853_v50 }
 0x203   : > { %v872_v6 = vadd.f32 %v859_v62, %v802_v1  ;;  %v894_v63 = vsel %vm890_vm9, %v871_v60, 0.0 }
 0x204   : > { %v892_v56 = vsel %vm890_vm9, %v870_v44, 0.0 }
 0x205   : > { %v893_v0 = vadd.f32 %v892_v56, %v891_v9  ;;  %v896_v52 = vsel %vm890_vm9, %v872_v6, 0.0 }
 0x207   : > { %v895_v10 = vadd.f32 %v894_v63, %v893_v0 }
 0x209   : > { %v897_v14 = vadd.f32 %v896_v52, %v895_v10 }
 0x20b   : > { %v1146_v3 = vpop.eup %1145 }
 0x20c   : > { %v862_v4 = vmul.f32 0.6931472, %v1146_v3 }
 0x20e   : > { %v868_v11 = vsel %vm867_vm11, %v865_v5, %v862_v4 }
 0x20f   : > { %v873_v12 = vadd.f32 %v868_v11, %v803_v8 }
 0x211   : > { %v889_v13 = vsel %vm884_vm12, %v873_v12, 0.0 }
 0x212   : > { %v898_v15 = vsel %vm890_vm9, %v889_v13, 0.0 }
 0x213   : > { %v899_v16 = vadd.f32 %v898_v15, %v897_v14 }
 0x215   : > { %900 = vadd.xlane.f32.xlu0 %v899_v16 }
 0x29e   : > { %v901_v17 = vpop.xlane.xlu0 %900 }
 0x29f   : > { %v902_v18 = vrot.slane %v901_v17, 4 }
 0x2a1   : > { %v903_v7 = vadd.f32 %v902_v18, %v901_v17 }
 0x2a3   : > { %v904_v19 = vrot.slane %v903_v7, 2 }
 0x2a5   : > { %v905_v20 = vadd.f32 %v904_v19, %v903_v7 }
 0x2a7   : > { %v906_v21 = vrot.slane %v905_v20, 1 }
 0x2a9   : > { %v907_v22 = vadd.f32 %v906_v21, %v905_v20 }
 0x2ab   : > { %1069 = vpush %v907_v22 }
 0x2dc   : > { %s1070_s30 = spop %1069 }
 0x2dd   : > { %s911_s9 = smul.f32 0.0009487666, %s1070_s30 }
 0x2df   : > { %913 = sst [smem:[#allocation9]] %s911_s9 }
 0x2e0 PF: > { %p1089_p7 = scmp.eq.s32.totalorder %s1308_s27, 4  ;;  %s1250_s26 = smov [#allocation8]  }
 0x2e1   : > { %s921_s24 = sshll.u32 %s1250_s26, 4  ;;  %s922_s24 = int_to_ptr.vmem [resolvable:$true] %s921_s24 }
 0x2e2   : > { %s1173_s10 = scalar_lea.vmem %s922_s24, 160  ;;  %p1180_p11 = scmp.lt.s32.totalorder %s922_s24, %s922_s24 }
 0x2e3   : > { %p1174_p8 = scmp.ne.s32.totalorder %s922_s24, %s1173_s10  ;;  %p1181_p12 = scmp.lt.s32.totalorder %s1173_s10, %s1173_s10 }
 0x2e5   : > { %p1175_p9 = pnand %p1174_p8, %p1089_p7  ;;  %p1182_p13 = por %p1181_p12, %p1180_p11 }
 0x2e7   : > { %p1176_p10 = pneg %p1175_p9 }
 0x2e9   : > { %p1183_p0 = pnand %p1182_p13, %p1176_p10 }
 0x2eb   : > { %1186 = shalt.err (!%p1183_p0)
}
 0x2ec   : > { %1076 = dma.vmem_to_hbm [thread:$0]  (%p1089_p7), %s922_s24, 160, %s1505_s6, [#allocation6]  }
 0x2ed   : > { %s1251_s13 = smov [#allocation9]  }
 0x2ee   : > { %1078 = dma.smem_to_hbm (%p1089_p7), %s1251_s13, 16, %s1506_s7, [#allocation7]  }
 0x2ef   : > { %1224 = dma.done.wait (%p1089_p7), [#allocation6], 160  }
 0x2f0   : > { %1226 = vsyncadd (%p1089_p7), [#allocation6], 4294967136 }
 0x2f1   : > { %1228 = dma.done.wait (%p1089_p7), [#allocation7], 16  }
 0x2f2   : > { %1230 = vsyncadd (%p1089_p7), [#allocation7], 4294967280 }
 0x2f3   : > { %942 = sfence }
 0x2f4 PF: > { %p18_p1 = scmp.ge.s32.totalorder %s1311_s28, 7   ;;  %s1514_s24 = smov %s1237_s25 }
 0x2f5   : > { %s1515_s25 = smov %s1321_s8  ;;  %s1516_s26 = smov %s1311_s28 }
 0x2f6   :  { %20 = sbr.rel (!%p18_p1) target bundleno = 4 (0x4), region = 137 }
 0x2fb   :  { %948 = vsyncpa [#allocation5], 1 }
 0x2fc   :  { %950 = vsyncpa [#allocation5 + $0x1], 1 }
 0x2fd   :  { %951 = vsyncpa [#allocation6], 1 }
 0x2fe   :  { %953 = vsyncpa [#allocation6 + $0x1], 1 }
 0x2ff   :  { %954 = vsyncpa [#allocation7], 1 }
 0x300   :  { %956 = vsyncpa [#allocation7 + $0x1], 1 }

</bundles_post_ra>
